<compile_context>
chip_gen: v7x
topology: tpu7x:2x2x1
jax: 0.10.0
libtpu: 0.0.40
codegen_flags: <defaults>
</compile_context>

<pallas_src>
import jax
import jax.numpy as jnp
from jax.experimental import pallas as pl
from jax.experimental.pallas import tpu as pltpu


def _add_pos_emb_kernel(x_ref, pe_ref, o_ref):
    # x_ref:  (Bt, Nt) slab of (flattened) activation rows
    # pe_ref: (1,  Nt) flattened positional-encoding chunk (broadcast over rows)
    # o_ref:  (Bt, Nt)
    o_ref[...] = (x_ref[...] + pe_ref[...]).astype(o_ref.dtype)


def learned_positional_embeddings(
    x: jax.Array,
    pos_enc: jax.Array,
    *,
    x_block_target_bytes: int = 2 * 1024 * 1024,  # ~2 MiB of x per block
) -> jax.Array:
    """x: (B, L, D); pos_enc: (max_len, D) with max_len == L (as the PyTorch
    forward requires).  Returns x + pos_enc broadcast over the batch dim,
    with PyTorch-style dtype promotion."""
    B, L, D = x.shape
    assert pos_enc.shape == (L, D), (
        "PyTorch forward `x + pe.repeat(B,1,1)` requires length == max_len"
    )

    out_dtype = jnp.result_type(x.dtype, pos_enc.dtype)
    N = L * D

    # Flatten to 2-D row views (contiguous reshape, no data movement).
    x2 = x.reshape(B, N)
    pe2 = pos_enc.reshape(1, N)

    x_isz = jnp.dtype(x.dtype).itemsize
    p_isz = jnp.dtype(pos_enc.dtype).itemsize
    o_isz = jnp.dtype(out_dtype).itemsize

    # Native sublane multiple of the narrowest of (x, out): 8 f32 / 16 bf16 / 32 i8.
    sub = max(8, 32 // min(x_isz, o_isz))

    # --- Column (lane) tiling -------------------------------------------------
    # Tile N when even a minimal (sub, N) x-block would exceed the budget.
    if N % 128 == 0:
        max_cols = max(128, (x_block_target_bytes // (sub * x_isz)) // 128 * 128)
        if max_cols >= N:
            nt = N
        else:
            # Largest 128-multiple divisor of N that fits the budget, so every
            # column block is full (no reliance on masked partial blocks).
            nt = 128
            c = max_cols
            while c >= 128:
                if N % c == 0:
                    nt = c
                    break
                c -= 128
    else:
        nt = N  # odd width: block equals the full array dim (always legal)
    col_steps = -(-N // nt)

    # --- Row (batch) tiling -----------------------------------------------------
    if B <= sub:
        bt = B  # block equals the full batch dim (always legal)
    else:
        bt = max(sub, (x_block_target_bytes // (nt * x_isz)) // sub * sub)
        bt = min(bt, (B // sub) * sub)
        # v7x: keep the grid >= ~8 steps (>= 4 per TensorCore) when B allows it,
        # so the "parallel" axes actually shard and DMA/compute overlap.
        min_grid_steps = 8
        if col_steps < min_grid_steps:
            want_rows = -(-min_grid_steps // col_steps)          # ceil
            bt_cap = -(-B // want_rows)                          # ceil(B / want_rows)
            bt_cap = max(sub, -(-bt_cap // sub) * sub)           # round up to sublane mult
            bt = min(bt, bt_cap)
    row_steps = -(-B // bt)

    grid = (row_steps, col_steps)

    cost = pl.CostEstimate(
        flops=B * N,
        transcendentals=0,
        bytes_accessed=int(
            B * N * x_isz        # read x
            + N * p_isz          # read pe (small, re-read per column block)
            + B * N * o_isz      # write out
        ),
    )

    out2 = pl.pallas_call(
        _add_pos_emb_kernel,
        out_shape=jax.ShapeDtypeStruct((B, N), out_dtype),
        grid=grid,
        in_specs=[
            pl.BlockSpec((bt, nt), lambda i, j: (i, j)),
            # Constant in the row axis -> only re-DMA'd when j changes.
            pl.BlockSpec((1, nt), lambda i, j: (0, j)),
        ],
        out_specs=pl.BlockSpec((bt, nt), lambda i, j: (i, j)),
        compiler_params=pltpu.CompilerParams(
            # Independent elementwise blocks; default scoped VMEM limits are
            # sufficient for ~2 MiB blocks on all generations.
            dimension_semantics=("parallel", "parallel"),
        ),
        cost_estimate=cost,
        # NOTE: in production, add input_output_aliases={0: 0} when x is
        # donated / dead after the call (avoids a second B*L*D HBM buffer).
    )(x2, pe2)

    return out2.reshape(B, L, D)


if __name__ == "__main__":
    # Small shapes consistent with the module's forward.
    B, L, D = 2, 8, 32
    MAX_LEN = L  # forward requires length == max_len

    key = jax.random.PRNGKey(0)
    kx, kp = jax.random.split(key)

    x = jax.random.normal(kx, (B, L, D), dtype=jnp.float32)
    # nn.Parameter(torch.zeros(max_len, d_model)) -- initialized non-zero here
    # so the check is non-trivial (zeros would make the add an identity).
    pos_enc = 0.02 * jax.random.normal(kp, (MAX_LEN, D), dtype=jnp.float32)

    # Pure-JAX reference of the PyTorch forward.
    ref = x + jnp.broadcast_to(pos_enc[None, :, :], (B, L, D))

    out = learned_positional_embeddings(x, pos_enc)
    out = jax.block_until_ready(out)

    assert out.shape == (B, L, D)
    assert out.dtype == ref.dtype
    assert jnp.allclose(out, ref, atol=1e-6), "mismatch vs reference"

    print("KERNEL_OK")
</pallas_src>

<mosaic_0001>
module attributes {stable_mosaic.version = 11 : i64} {
  func.func @_add_pos_emb_kernel(%arg0: i32, %arg1: i32, %arg2: memref<2x256xf32, #tpu.memory_space<vmem>>, %arg3: memref<1x256xf32, #tpu.memory_space<vmem>>, %arg4: memref<2x256xf32, #tpu.memory_space<vmem>>) attributes {dimension_semantics = [#tpu.dimension_semantics<parallel>, #tpu.dimension_semantics<parallel>], iteration_bounds = array<i64: 1, 1>, scalar_prefetch = 0 : i64, scratch_operands = 0 : i64, tpu.core_type = #tpu.core_type<tc>, window_params = [{transform_indices = @transform_0, window_bounds = array<i64: 2, 256>}, {transform_indices = @transform_1, window_bounds = array<i64: 1, 256>}, {transform_indices = @transform_2, window_bounds = array<i64: 2, 256>}]} {
    %c0 = arith.constant 0 : index
    %c0_0 = arith.constant 0 : index
    %0 = vector.load %arg2[%c0, %c0_0] : memref<2x256xf32, #tpu.memory_space<vmem>>, vector<2x256xf32>
    %c0_1 = arith.constant 0 : index
    %c0_2 = arith.constant 0 : index
    %1 = vector.load %arg3[%c0_1, %c0_2] : memref<1x256xf32, #tpu.memory_space<vmem>>, vector<1x256xf32>
    %2 = vector.broadcast %1 : vector<1x256xf32> to vector<2x256xf32>
    %3 = arith.addf %0, %2 : vector<2x256xf32>
    %c0_3 = arith.constant 0 : index
    %c0_4 = arith.constant 0 : index
    %4 = vector.load %arg4[%c0_3, %c0_4] : memref<2x256xf32, #tpu.memory_space<vmem>>, vector<2x256xf32>
    tpu.vector_store %arg4[%c0_3, %c0_4], %3 {strides = array<i32>} : memref<2x256xf32, #tpu.memory_space<vmem>>, vector<2x256xf32>,
    return
  }
  func.func @transform_0(%arg0: i32, %arg1: i32) -> (i32, i32) {
    %c0_i32 = arith.constant 0 : i32
    return %arg0, %arg1 : i32, i32
  }
  func.func @transform_1(%arg0: i32, %arg1: i32) -> (i32, i32) {
    %c0_i32 = arith.constant 0 : i32
    %c0_i32_0 = arith.constant 0 : i32
    return %c0_i32, %arg1 : i32, i32
  }
  func.func @transform_2(%arg0: i32, %arg1: i32) -> (i32, i32) {
    %c0_i32 = arith.constant 0 : i32
    return %arg0, %arg1 : i32, i32
  }
}

</mosaic_0001>

<bundles_post_ra>
// kernel: tpu_custom_call.1
= control target key start
LH: loop header
LB: loop body
LE: loop exit
PB: predicated region body
PF: predicated region fallthrough
CT: control target
= control target key end

     0   :  { %7 = vsyncpa [#allocation3], 0  ;;  %s157_s0 = inlined_call_operand.hbm [shape: f32[2,256], index: 0, kind: input, shape index: {}]   ;;  %s158_s1 = inlined_call_operand.vmem [shape: f32[1,256], index: 1, kind: input, shape index: {}]   ;;  %s159_s2 = inlined_call_operand.hbm [shape: f32[2,256], index: 2, kind: output, shape index: {}]  }
   0x1   :  { %8 = vsyncpa [#allocation4], 0  ;;  %s112_s9 = smov [#allocation2]   ;;  %s64_s13 = scalar_lea.hbm %s157_s0, 64 }
   0x2   :  { %s15_s10 = sshll.u32 %s112_s9, 4  ;;  %p65_p0 = scmp.ne.s32.totalorder %s157_s0, %s64_s13  ;;  %s16_s10 = int_to_ptr.vmem [resolvable:$true] %s15_s10 }
   0x3   :  { %p68_p1 = scmp.lt.u32.totalorder %s64_s13, %s157_s0 }
   0x5   :  { %p70_p2 = pnand %p68_p1, %p65_p0 }
   0x7   :  { %73 = shalt.err (!%p70_p2)
}
   0x8   :  { %s74_s18 = scalar_lea.vmem %s16_s10, 64  ;;  %p79_p4 = scmp.lt.s32.totalorder %s16_s10, %s16_s10 }
   0x9   :  { %p75_p3 = scmp.ne.s32.totalorder %s16_s10, %s74_s18  ;;  %p80_p5 = scmp.lt.s32.totalorder %s74_s18, %s74_s18 }
   0xb   :  { %p81_p6 = por %p80_p5, %p79_p4 }
   0xd   :  { %p82_p7 = pnand %p81_p6, %p75_p3 }
   0xf   :  { %85 = shalt.err (!%p82_p7)
}
  0x10   :  { %18 = dma.hbm_to_vmem [thread:$0]  %s157_s0, 64, %s16_s10, [#allocation3]  }
  0x11   :  { %108 = dma.done.wait [#allocation3], 64  }
  0x12   :  { %109 = vsyncadd [#allocation3], 4294967232  ;;  %v27_v0 = vlaneseq  ;;  %v113_v1 = vmov 1983009808   ;;  %v25_v7 = vld [vmem:[%s158_s1] sm:$0x3] }
  0x13   :  { %v37_v2 = vunpack.c.l.s4 %v113_v1  ;;  %v24_v12 = vld [vmem:[#allocation2] sm:$0xf]  ;;  %s114_s23 = smov [#allocation5]  }
  0x14   :  { %v28_v3 = vshrl.u32 %v27_v0, 7  ;;  %s52_s0 = sshll.u32 %s114_s23, 4  ;;  %s53_s0 = int_to_ptr.vmem [resolvable:$true] %s52_s0 }
  0x15   :  { %v38_v6 = vunpack.c.0.s8 %v37_v2  ;;  %s86_s24 = scalar_lea.vmem %s53_s0, 64  ;;  %p91_p9 = scmp.lt.s32.totalorder %s53_s0, %s53_s0 }
  0x16   :  { %v29_v4 = vsub.s32 0, %v28_v3  ;;  %v33_v5 = vsub.s32 1, %v28_v3  ;;  %p87_p8 = scmp.ne.s32.totalorder %s53_s0, %s86_s24  ;;  %p92_p10 = scmp.lt.s32.totalorder %s86_s24, %s86_s24 }
  0x17   :  { %v41_v10 = vsub.s32 %v38_v6, %v28_v3 }
  0x18   :  { %v30_v8 = vrot.slane %v25_v7, %v29_v4  ;;  %v34_v9 = vrot.slane %v25_v7, %v33_v5  ;;  %p93_p11 = por %p92_p10, %p91_p9 }
  0x1a   :  { %v35_v11 = vcombine.low %v30_v8, %v34_v9  ;;  %p94_p12 = pnand %p93_p11, %p87_p8 }
  0x1c   :  { %v42_v13 = vrot.slane %v35_v11, %v41_v10 }
  0x1e   :  { %v44_v14 = vadd.f32 %v42_v13, %v24_v12 }
  0x20   :  { %45 = vst [vmem:[#allocation5] sm:$0xf] %v44_v14 }
  0x21   :  { %97 = shalt.err (!%p94_p12)
}
  0x22   :  { %s98_s26 = scalar_lea.hbm %s159_s2, 64 }
  0x23   :  { %p99_p13 = scmp.ne.s32.totalorder %s159_s2, %s98_s26  ;;  %p102_p0 = scmp.lt.u32.totalorder %s98_s26, %s159_s2 }
  0x25   :  { %p104_p1 = pnand %p102_p0, %p99_p13 }
  0x27   :  { %107 = shalt.err (!%p104_p1)
}
  0x28   :  { %55 = dma.vmem_to_hbm [thread:$0]  %s53_s0, 64, %s159_s2, [#allocation4]  }
  0x29   :  { %110 = dma.done.wait [#allocation4], 64  }
  0x2a   :  { %111 = vsyncadd [#allocation4], 4294967232 }
  0x2b   :  { %59 = vsyncpa [#allocation3], 1 }
  0x2c   :  { %60 = vsyncpa [#allocation4], 1 }

</bundles_post_ra>
